<compile_context>
chip_gen: v7x
topology: tpu7x:2x2x1
jax: 0.10.0
libtpu: 0.0.40
codegen_flags: <defaults>
</compile_context>

<pallas_src>
import functools
import math

import jax
import jax.numpy as jnp
from jax.experimental import pallas as pl
from jax.experimental.pallas import tpu as pltpu

_BN_EPS = 1e-5


def _round_up(x, m):
    return (x + m - 1) // m * m


# ----------------------------- Pallas kernels -----------------------------

def _mm_bias_kernel(a_ref, b_ref, bias_ref, o_ref, *, relu):
    """Single-shot matmul (full K in one block) + bias + optional ReLU."""
    y = jnp.dot(a_ref[...], b_ref[...], preferred_element_type=jnp.float32)
    y = y + bias_ref[...]
    if relu:
        y = jnp.maximum(y, 0.0)
    o_ref[...] = y.astype(o_ref.dtype)


def _mm_bias_res_kernel(a_ref, b_ref, bias_ref, res_ref, o_ref, *, relu):
    """Matmul + bias + residual add + optional ReLU (residual variant only)."""
    y = jnp.dot(a_ref[...], b_ref[...], preferred_element_type=jnp.float32)
    y = y + bias_ref[...] + res_ref[...]
    if relu:
        y = jnp.maximum(y, 0.0)
    o_ref[...] = y.astype(o_ref.dtype)


def _maxpool_kernel(p_ref, o_ref):
    """Max over the leading (window-tap) axis of a (9, TM, C) patch block."""
    acc = p_ref[0]
    for k in range(1, p_ref.shape[0]):
        acc = jnp.maximum(acc, p_ref[k])
    o_ref[...] = acc


# ----------------------------- Pallas wrappers -----------------------------

def _pad_rows(m):
    """Row padding policy: multiple of 16 for small M, multiple of 128 above."""
    return _round_up(m, 16) if m <= 128 else _round_up(m, 128)


def _fused_conv_matmul(a, b, bias, res, relu):
    """a:(M,K) bf16 patches, b:(Kp,N) bf16 weights (K pre-padded at init),
    bias:(1,N) f32, res:(M,N) f32 or None. Returns (M,N) f32."""
    M, K = a.shape
    Kp, N = b.shape
    Mp = _pad_rows(M)

    if Mp != M or Kp != K:
        a = jnp.pad(a, ((0, Mp - M), (0, Kp - K)))
    if res is not None and Mp != M:
        res = jnp.pad(res, ((0, Mp - M), (0, 0)))

    # Problem-sized tiles; full K in one block (no reduction grid axis).
    tn = N if N < 128 else 128
    tm = min(128, Mp)
    # Make sure at least 2 grid programs exist so a 2nd TensorCore (v7x) has work.
    if (Mp // tm) * (N // tn) < 2 and tm % 32 == 0:
        tm //= 2

    in_specs = [
        pl.BlockSpec((tm, Kp), lambda i, j: (i, 0)),
        pl.BlockSpec((Kp, tn), lambda i, j: (0, j)),
        pl.BlockSpec((1, tn), lambda i, j: (0, j)),
    ]
    args = [a, b, bias]
    if res is not None:
        in_specs.append(pl.BlockSpec((tm, tn), lambda i, j: (i, j)))
        args.append(res)
        kernel = functools.partial(_mm_bias_res_kernel, relu=relu)
    else:
        kernel = functools.partial(_mm_bias_kernel, relu=relu)

    out = pl.pallas_call(
        kernel,
        out_shape=jax.ShapeDtypeStruct((Mp, N), jnp.float32),
        grid_spec=pltpu.PrefetchScalarGridSpec(
            num_scalar_prefetch=0,
            grid=(Mp // tm, N // tn),
            in_specs=in_specs,
            out_specs=pl.BlockSpec((tm, tn), lambda i, j: (i, j)),
        ),
        compiler_params=pltpu.CompilerParams(
            dimension_semantics=("parallel", "parallel")),
    )(*args)
    return out[:M] if Mp != M else out


def _im2col(x, kh, kw, stride, padding):
    """x: NHWC (bf16) -> patches (N*OH*OW, kh*kw*C), column order (kh, kw, c)."""
    N, H, W, C = x.shape
    if padding:
        x = jnp.pad(x, ((0, 0), (padding, padding), (padding, padding), (0, 0)))
    OH = (H + 2 * padding - kh) // stride + 1
    OW = (W + 2 * padding - kw) // stride + 1
    cols = [x[:, i:i + stride * OH:stride, j:j + stride * OW:stride, :]
            for i in range(kh) for j in range(kw)]
    p = jnp.stack(cols, axis=3)                      # (N, OH, OW, kh*kw, C)
    return p.reshape(N * OH * OW, kh * kw * C), OH, OW


def conv_bn(x, wm, bias, kh, kw, stride, padding, relu=True, residual=None):
    """x: NHWC f32, wm: (Kp, Cout) bf16 (BN scale folded, K padded). NHWC out."""
    # TODO(synk): fusing im2col into the matmul kernel (kh*kw grid axis with
    # shifted-window index_maps) would remove the patch materialization in HBM.
    N = x.shape[0]
    Cout = wm.shape[1]
    patches, OH, OW = _im2col(x.astype(jnp.bfloat16), kh, kw, stride, padding)
    M = patches.shape[0]
    res = residual.reshape(M, Cout) if residual is not None else None
    out = _fused_conv_matmul(patches, wm, bias, res, relu)
    return out.reshape(N, OH, OW, Cout)


def maxpool_3x3_s2(x):
    """3x3 / stride 2 / pad 1 max pool, NHWC, tiled Pallas reduction kernel."""
    N, H, W, C = x.shape
    OH = (H + 2 - 3) // 2 + 1
    OW = (W + 2 - 3) // 2 + 1
    xp = jnp.pad(x, ((0, 0), (1, 1), (1, 1), (0, 0)),
                 constant_values=-jnp.inf)
    slices = [xp[:, i:i + 2 * OH:2, j:j + 2 * OW:2, :].reshape(N * OH * OW, C)
              for i in range(3) for j in range(3)]
    p = jnp.stack(slices, axis=0)                    # (9, M, C)
    M = N * OH * OW
    Mp = _pad_rows(M)
    if Mp != M:
        p = jnp.pad(p, ((0, 0), (0, Mp - M), (0, 0)))
    tm = min(128, Mp)
    out = pl.pallas_call(
        _maxpool_kernel,
        out_shape=jax.ShapeDtypeStruct((Mp, C), jnp.float32),
        grid_spec=pltpu.PrefetchScalarGridSpec(
            num_scalar_prefetch=0,
            grid=(Mp // tm,),
            in_specs=[pl.BlockSpec((9, tm, C), lambda i: (0, i, 0))],
            out_specs=pl.BlockSpec((tm, C), lambda i: (i, 0)),
        ),
        compiler_params=pltpu.CompilerParams(
            dimension_semantics=("parallel",)),
    )(p)
    out = out[:M] if Mp != M else out
    return out.reshape(N, OH, OW, C)


# ----------------------------- parameter init -----------------------------

def _init_conv_bn(key, kh, kw, cin, cout):
    """Returns (wm, bias): wm = (Kp, cout) bf16 with BN scale folded & K padded,
    bias = (1, cout) f32 with eval-mode BN folded."""
    k1, k2, k3, k4, k5 = jax.random.split(key, 5)
    fan_in = kh * kw * cin
    w = jax.random.normal(k1, (kh, kw, cin, cout), jnp.float32) / math.sqrt(fan_in)
    gamma = jax.random.uniform(k2, (cout,), jnp.float32, 0.8, 1.2)
    beta = jax.random.normal(k3, (cout,), jnp.float32) * 0.05
    mean = jax.random.normal(k4, (cout,), jnp.float32) * 0.05
    var = jax.random.uniform(k5, (cout,), jnp.float32, 0.8, 1.2)
    scale = gamma / jnp.sqrt(var + _BN_EPS)
    bias = beta - mean * scale
    wm = (w * scale).reshape(kh * kw * cin, cout)      # fold BN scale into W
    K = kh * kw * cin
    Kp = _round_up(K, 128)
    if Kp != K:
        wm = jnp.pad(wm, ((0, Kp - K), (0, 0)))        # pad contraction dim once
    return (wm.astype(jnp.bfloat16), bias.reshape(1, cout).astype(jnp.float32))


def init_params(key):
    params = {"conv1": _init_conv_bn(jax.random.fold_in(key, 0), 7, 7, 3, 64)}
    cfg = [(64, 64, 3, 1), (64, 128, 4, 2), (128, 256, 6, 2), (256, 512, 3, 2)]
    idx = 1
    layers = []
    for (cin, cout, nblocks, stride) in cfg:
        blocks = []
        for b in range(nblocks):
            s = stride if b == 0 else 1
            ci = cin if b == 0 else cout
            block = {
                "conv1": _init_conv_bn(jax.random.fold_in(key, idx), 3, 3, ci, cout),
                "conv2": _init_conv_bn(jax.random.fold_in(key, idx + 1), 3, 3, cout, cout),
            }
            idx += 2
            if s != 1 or ci != cout:
                block["downsample"] = _init_conv_bn(
                    jax.random.fold_in(key, idx), 1, 1, ci, cout)
                idx += 1
            blocks.append(block)
        layers.append(blocks)
    params["layers"] = layers
    return params


# ----------------------------- forward pass -----------------------------

def _basic_block(x, p, stride):
    # TODO(synk): conv1+conv2(+downsample) could be fused into one pallas_call
    # with the intermediate kept in VMEM to cut per-call overhead for tiny late
    # layers; kept as separate fused-matmul calls here.
    if "downsample" in p:
        wm, b = p["downsample"]
        identity = conv_bn(x, wm, b, 1, 1, stride, 0, relu=False)
    else:
        identity = x
    wm, b = p["conv1"]
    h = conv_bn(x, wm, b, 3, 3, stride, 1, relu=True)
    wm, b = p["conv2"]
    return conv_bn(h, wm, b, 3, 3, 1, 1, relu=True, residual=identity)


def resnet_modified_small_forward(params, x_nchw):
    x = jnp.transpose(x_nchw, (0, 2, 3, 1)).astype(jnp.float32)  # NCHW -> NHWC
    wm, b = params["conv1"]
    x = conv_bn(x, wm, b, 7, 7, stride=2, padding=3, relu=True)   # conv1+bn1+relu
    x = maxpool_3x3_s2(x)                                         # maxpool
    for li, blocks in enumerate(params["layers"]):                # layer1..4
        layer_stride = 1 if li == 0 else 2
        for bi, blk in enumerate(blocks):
            x = _basic_block(x, blk, layer_stride if bi == 0 else 1)
    # TODO(synk): Dropout2d(p=0.2) is identity in eval/inference mode; training-mode
    # stochastic channel dropout is not reproduced here.
    return jnp.transpose(x, (0, 3, 1, 2))                         # back to NCHW


# ----------------------------- main -----------------------------

if __name__ == "__main__":
    key = jax.random.PRNGKey(0)
    pkey, xkey = jax.random.split(key)
    params = init_params(pkey)
    x = jax.random.normal(xkey, (2, 3, 32, 32), jnp.float32)      # small NCHW input
    out = resnet_modified_small_forward(params, x)
    out = jax.block_until_ready(out)
    assert out.shape == (2, 512, 1, 1), out.shape
    assert bool(jnp.all(jnp.isfinite(out)))
    print("KERNEL_OK")
</pallas_src>

<mosaic_0001>
module attributes {stable_mosaic.version = 11 : i64} {
  func.func @_mm_bias_kernel(%arg0: i32, %arg1: i32, %arg2: memref<128x256xbf16, #tpu.memory_space<vmem>>, %arg3: memref<256x64xbf16, #tpu.memory_space<vmem>>, %arg4: memref<1x64xf32, #tpu.memory_space<vmem>>, %arg5: memref<128x64xf32, #tpu.memory_space<vmem>>) attributes {dimension_semantics = [#tpu.dimension_semantics<parallel>, #tpu.dimension_semantics<parallel>], iteration_bounds = array<i64: 4, 1>, scalar_prefetch = 0 : i64, scratch_operands = 0 : i64, tpu.core_type = #tpu.core_type<tc>, window_params = [{transform_indices = @transform_0, window_bounds = array<i64: 128, 256>}, {transform_indices = @transform_1, window_bounds = array<i64: 256, 64>}, {transform_indices = @transform_2, window_bounds = array<i64: 1, 64>}, {transform_indices = @transform_3, window_bounds = array<i64: 128, 64>}]} {
    %c0 = arith.constant 0 : index
    %c0_0 = arith.constant 0 : index
    %0 = vector.load %arg2[%c0, %c0_0] : memref<128x256xbf16, #tpu.memory_space<vmem>>, vector<128x256xbf16>
    %c0_1 = arith.constant 0 : index
    %c0_2 = arith.constant 0 : index
    %1 = vector.load %arg3[%c0_1, %c0_2] : memref<256x64xbf16, #tpu.memory_space<vmem>>, vector<256x64xbf16>
    %cst = arith.constant dense<0.000000e+00> : vector<128x64xf32>
    %2 = tpu.matmul %0, %1, %cst {dimension_numbers = #tpu.dot_dimension_numbers<[1], [0], [0], [1], [0, 0, 1, 1], [], []>} : vector<128x256xbf16>, vector<256x64xbf16>, vector<128x64xf32> -> vector<128x64xf32>
    %c0_3 = arith.constant 0 : index
    %c0_4 = arith.constant 0 : index
    %3 = vector.load %arg4[%c0_3, %c0_4] : memref<1x64xf32, #tpu.memory_space<vmem>>, vector<1x64xf32>
    %4 = vector.broadcast %3 : vector<1x64xf32> to vector<128x64xf32>
    %5 = arith.addf %2, %4 : vector<128x64xf32>
    %cst_5 = arith.constant 0.000000e+00 : f32
    %6 = vector.broadcast %cst_5 : f32 to vector<128x64xf32>
    %7 = arith.maximumf %5, %6 : vector<128x64xf32>
    %c0_6 = arith.constant 0 : index
    %c0_7 = arith.constant 0 : index
    %8 = vector.load %arg5[%c0_6, %c0_7] : memref<128x64xf32, #tpu.memory_space<vmem>>, vector<128x64xf32>
    tpu.vector_store %arg5[%c0_6, %c0_7], %7 {strides = array<i32>} : memref<128x64xf32, #tpu.memory_space<vmem>>, vector<128x64xf32>,
    return
  }
  func.func @transform_0(%arg0: i32, %arg1: i32) -> (i32, i32) {
    %c0_i32 = arith.constant 0 : i32
    %c0_i32_0 = arith.constant 0 : i32
    return %arg0, %c0_i32 : i32, i32
  }
  func.func @transform_1(%arg0: i32, %arg1: i32) -> (i32, i32) {
    %c0_i32 = arith.constant 0 : i32
    %c0_i32_0 = arith.constant 0 : i32
    return %c0_i32, %arg1 : i32, i32
  }
  func.func @transform_2(%arg0: i32, %arg1: i32) -> (i32, i32) {
    %c0_i32 = arith.constant 0 : i32
    %c0_i32_0 = arith.constant 0 : i32
    return %c0_i32, %arg1 : i32, i32
  }
  func.func @transform_3(%arg0: i32, %arg1: i32) -> (i32, i32) {
    %c0_i32 = arith.constant 0 : i32
    return %arg0, %arg1 : i32, i32
  }
}

</mosaic_0001>

<bundles_post_ra>
// kernel: tpu_custom_call.1
= control target key start
LH: loop header
LB: loop body
LE: loop exit
PB: predicated region body
PF: predicated region fallthrough
CT: control target
= control target key end

     0   :  { %8 = vsyncpa [#allocation3], 0  ;;  %s1297_s0 = inlined_call_operand.hbm [shape: bf16[512,256], index: 0, kind: input, shape index: {}]   ;;  %s1298_s1 = inlined_call_operand.vmem [shape: bf16[256,64], index: 1, kind: input, shape index: {}]   ;;  %s1299_s2 = inlined_call_operand.vmem [shape: f32[1,64], index: 2, kind: input, shape index: {}]   ;;  %s1300_s3 = inlined_call_operand.vmem [shape: f32[512,64], index: 3, kind: output, shape index: {}]  }
   0x1   :  { %10 = vsyncpa [#allocation3 + $0x1], 0  ;;  %s1053_s12 = smov 0   ;;  %s1055_s13 = smov 0  }
   0x2   :  { %s1057_s14 = smov 0   ;;  %s1059_s15 = smov 0  }
   0x3   :  { %s1061_s16 = smov 0   ;;  %s1063_s17 = smov 0  }
   0x4 LB: > { %s720_s18 = sadd.s32 4294967295, %s1028_s17   ;;  %s28_s19 = sadd.s32 1, %s1024_s16  ;;  %s1028_s17 = sphi %s1063_s17, %s16_s17   ;;  %s1024_s16 = sphi %s1061_s16, %s1308_s16   ;;  %s1020_s15 = sphi %s1059_s15, %s1307_s15   ;;  %s1016_s14 = sphi %s1057_s14, %s1306_s14   ;;  %s1012_s13 = sphi %s1055_s13, %s1305_s13   ;;  %s1008_s12 = sphi %s1053_s12, %s1304_s12  }
   0x5   : > { %p30_p0 = scmp.ge.s32.totalorder %s28_s19, 4  ;;  %s35_s20 = sadd.s32 1, %s1016_s14 }
   0x6   : > { %p42_p1 = scmp.ne.s32.totalorder %s1016_s14, %s1012_s13  ;;  %p43_p2 = scmp.eq.s32.totalorder %s1028_s17, 0 }
   0x7   : > { %s1310_s19 = smov (%p30_p0, %s28_s19), 0  ;;  %p48_p4 = scmp.ne.s32.totalorder %s1012_s13, %s1008_s12 }
   0x8   : > { %p1089_p3 = por %p43_p2, %p42_p1  ;;  %s32_s22 = ssub.s32 %s1024_s16, %s1310_s19 }
   0x9   : > { %p49_p5 = scmp.eq.s32.totalorder %s720_s18, 0  ;;  %p33_p6 = scmp.eq.s32.totalorder %s32_s22, 0 }
   0xa   : > { %p857_p8 = scmp.lt.s32.totalorder %s1028_s17, 4  ;;  %s165_s25 = sand.u32 1, %s1016_s14  }
   0xb   : > { %p1096_p7 = por %p49_p5, %p48_p4  ;;  %s770_s26 = sshll.u32 %s1024_s16, 11 }
   0xc   : > { %s1102_s24 = scalar_select %p33_p6, %s1016_s14, %s35_s20  }
   0xd   : > { %s726_s27 = sshll.u32 %s165_s25, 7  ;;  %s1109_s30 = scalar_lea.hbm %s1297_s0, %s770_s26 }
   0xe   : > { %s169_s4 = scalar_lea.vmem [#allocation2], %s726_s27  ;;  %p1113_p9 = pnand %p857_p8, %p1089_p3 }
   0xf   : > { %s177_s5 = sshll.u32 %s169_s4, 4  ;;  %s1119_s7 = scalar_lea.sflag [#allocation3], %s165_s25  ;;  %s1117_s5 = int_to_ptr.vmem [resolvable:$true] %s177_s5 }
  0x10   : > { %s948_s8 = scalar_lea.hbm %s1109_s30, 2048  ;;  %p950_p11 = pneg %p1113_p9 }
  0x11   : > { %p949_p10 = scmp.ne.s32.totalorder %s1109_s30, %s948_s8  ;;  %s953_s11 = scalar_lea.hbm %s1297_s0, 8192 }
  0x12   : > { %p954_p0 = scmp.lt.u32.totalorder %s1109_s30, %s1297_s0  ;;  %p955_p1 = scmp.lt.u32.totalorder %s953_s11, %s948_s8 }
  0x13   : > { %p951_p12 = pnand %p950_p11, %p949_p10  ;;  %p957_p3 = scmp.lt.u32.totalorder %s948_s8, %s1109_s30 }
  0x14   : > { %p956_p2 = por %p955_p1, %p954_p0 }
  0x15   : > { %p952_p13 = pneg %p951_p12 }
  0x16   : > { %p958_p4 = por %p957_p3, %p956_p2 }
  0x18   : > { %p959_p5 = pnand %p958_p4, %p952_p13 }
  0x1a   : > { %962 = shalt.err (!%p959_p5)
}
  0x1b   : > { %s963_s20 = scalar_lea.vmem %s1117_s5, 2048  ;;  %s1030_s21 = smov [#allocation2]  }
  0x1c   : > { %p964_p6 = scmp.ne.s32.totalorder %s1117_s5, %s963_s20  ;;  %s968_s22 = sshll.u32 %s1030_s21, 4  ;;  %s969_s22 = int_to_ptr.vmem [resolvable:$false] %s968_s22 }
  0x1d   : > { %s970_s25 = scalar_lea.vmem %s969_s22, 4096  ;;  %p971_p12 = scmp.lt.s32.totalorder %s1117_s5, %s969_s22 }
  0x1e   : > { %p966_p8 = pnand %p964_p6, %p950_p11  ;;  %p972_p0 = scmp.lt.s32.totalorder %s970_s25, %s963_s20 }
  0x20   : > { %p967_p10 = pneg %p966_p8  ;;  %p973_p1 = por %p972_p0, %p971_p12 }
  0x22   : > { %p974_p2 = pnand %p973_p1, %p967_p10 }
  0x24   : > { %977 = shalt.err (!%p974_p2)
}
  0x25   : > { %s1031_s26 = smov 128   ;;  %s1032_s27 = smov 8  }
  0x26   : > { %856 = dma.hbm_to_vmem [thread:$0]  (!%p1113_p9), %s1109_s30, 2048, %s1117_s5, %s1119_s7, %s1031_s26, %s1031_s26, %s1032_s27  }
  0x27   : > { %p730_p11 = scmp.ge.s32.totalorder %s1028_s17, 1  ;;  %p185_p13 = scmp.lt.s32.totalorder %s1028_s17, 5 }
  0x29   : > { %p186_p3 = pnand %p730_p11, %p185_p13 }
  0x2a   : > { %s191_s28 = sand.u32 (!%p186_p3), 1, %s1012_s13  }
  0x2b   : > { %189 = sbr.rel (%p186_p3) target bundleno = 330 (0x14a), region = 32  ;;  %s731_s29 = sshll.u32 (!%p186_p3), %s191_s28, 7 }
  0x2c   : > { %s192_s4 = scalar_lea.sflag (!%p186_p3), [#allocation3], %s191_s28  ;;  %s1150_s8 = scalar_lea.vmem (!%p186_p3), [#allocation2], %s731_s29 }
  0x32   : > { %1003 = dma.done.wait (%p1096_p7), %s192_s4, 2048  }
  0x33   : > { %1005 = vsyncadd (%p1096_p7), %s192_s4, 4294965248  ;;  %v908_v0 = vld [vmem:[%s1298_s1 + $0x40] sm:$0xff]   ;;  %v910_v2 = vld [vmem:[%s1298_s1 + $0x48] sm:$0xff]   ;;  %s732_s25 = sshll.u32 %s1020_s15, 4  ;;  %vm590_vm0 = vcmask 523264  }
  0x34   : > { %v909_v1 = vld [vmem:[%s1298_s1] sm:$0xff]   ;;  %771 = vmatprep.subr.bf16.mxu0 %v908_v0  ;;  %835 = vmatprep.subr.bf16.mxu1 %v908_v0  ;;  %v911_v3 = vld [vmem:[%s1298_s1 + $0x8] sm:$0xff]   ;;  %v912_v4 = vld [vmem:[%s1298_s1 + $0x50] sm:$0xff]   ;;  %p237_p7 = scmp.lt.s32.totalorder %s732_s25, 63 }
  0x35   : > { %772 = vmatpush3.bf16.msra.mxu0 %v909_v1  ;;  %843 = vmatpush3.bf16.msra.mxu1 %v909_v1  ;;  %v913_v5 = vld [vmem:[%s1298_s1 + $0x10] sm:$0xff]   ;;  %v914_v6 = vld [vmem:[%s1298_s1 + $0x58] sm:$0xff]   ;;  %v916_v8 = vld [vmem:[%s1298_s1 + $0x60] sm:$0xff]  }
  0x36   : > { %773 = vmatprep.subr.bf16.mxu0 %v910_v2  ;;  %836 = vmatprep.subr.bf16.mxu1 %v910_v2  ;;  %v915_v7 = vld [vmem:[%s1298_s1 + $0x18] sm:$0xff]   ;;  %v917_v9 = vld [vmem:[%s1298_s1 + $0x20] sm:$0xff]   ;;  %v918_v10 = vld [vmem:[%s1298_s1 + $0x68] sm:$0xff]   ;;  %s1312_s25 = smov (!%p237_p7, %s732_s25), 63 }
  0x37   : > { %v926_v11 = vld [vmem:[%s1150_s8 + $0x4] ss:$8 sps:$4 sm:$0xff]   ;;  %v920_v14 = vld [vmem:[%s1298_s1 + $0x70] sm:$0xff]   ;;  %v922_v16 = vld [vmem:[%s1298_s1 + $0x78] sm:$0xff]   ;;  %s733_s28 = sshll.u32 %s1312_s25, 3 }
  0x38   : > { %v929_v12 = vld [vmem:[%s1150_s8 + $0x44] ss:$8 sps:$4 sm:$0xff]   ;;  %509 = vmatprep.mubr.bf16.mxu0 %v926_v11  ;;  %v921_v15 = vld [vmem:[%s1298_s1 + $0x30] sm:$0xff]   ;;  %v923_v17 = vld [vmem:[%s1298_s1 + $0x38] sm:$0xff]   ;;  %s1231_s29 = scalar_lea.vmem %s1300_s3, %s733_s28 }
  0x39   : > { %774 = vmatpush3.bf16.msra.mxu0 %v911_v3  ;;  %844 = vmatpush3.bf16.msra.mxu1 %v911_v3  ;;  %v919_v13 = vld [vmem:[%s1298_s1 + $0x28] sm:$0xff]   ;;  %v930_v20 = vld [vmem:[%s1150_s8 + $0x14] ss:$8 sps:$4 sm:$0xff]   ;;  %v934_v22 = vld [vmem:[%s1150_s8 + $0x10] ss:$8 sps:$4 sm:$0xff]  }
  0x3a   : > { %775 = vmatprep.subr.bf16.mxu0 %v912_v4  ;;  %837 = vmatprep.subr.bf16.mxu1 %v912_v4  ;;  %v924_v18 = vld [vmem:[%s1150_s8] ss:$8 sps:$4 sm:$0xff]   ;;  %v932_v21 = vld [vmem:[%s1150_s8 + $0x54] ss:$8 sps:$4 sm:$0xff]   ;;  %v935_v23 = vld [vmem:[%s1150_s8 + $0x50] ss:$8 sps:$4 sm:$0xff]  }
  0x3b   : > { %541 = vmatprep.mubr.bf16.mxu1 %v929_v12  ;;  %v927_v19 = vld [vmem:[%s1150_s8 + $0x40] ss:$8 sps:$4 sm:$0xff]   ;;  %v936_v24 = vld [vmem:[%s1150_s8 + $0x24] ss:$8 sps:$4 sm:$0xff]   ;;  %v942_v28 = vld [vmem:[%s1150_s8 + $0x34] ss:$8 sps:$4 sm:$0xff]  }
  0x3c   : > { %v938_v25 = vld [vmem:[%s1150_s8 + $0x64] ss:$8 sps:$4 sm:$0xff]   ;;  %v940_v26 = vld [vmem:[%s1150_s8 + $0x20] ss:$8 sps:$4 sm:$0xff]   ;;  %v944_v29 = vld [vmem:[%s1150_s8 + $0x74] ss:$8 sps:$4 sm:$0xff]  }
  0x3d   : > { %776 = vmatpush3.bf16.msra.mxu0 %v913_v5  ;;  %845 = vmatpush3.bf16.msra.mxu1 %v913_v5  ;;  %v941_v27 = vld [vmem:[%s1150_s8 + $0x60] ss:$8 sps:$4 sm:$0xff]   ;;  %v946_v30 = vld [vmem:[%s1150_s8 + $0x30] ss:$8 sps:$4 sm:$0xff]  }
  0x3e   : > { %777 = vmatprep.subr.bf16.mxu0 %v914_v6  ;;  %838 = vmatprep.subr.bf16.mxu1 %v914_v6  ;;  %v947_v31 = vld [vmem:[%s1150_s8 + $0x70] ss:$8 sps:$4 sm:$0xff]   ;;  %v1224_v34 = vld [vmem:[%s1299_s2] ss:$0 sm:$0xff] }
  0x41   : > { %778 = vmatpush3.bf16.msra.mxu0 %v915_v7  ;;  %846 = vmatpush3.bf16.msra.mxu1 %v915_v7 }
  0x42   : > { %779 = vmatprep.subr.bf16.mxu0 %v916_v8  ;;  %839 = vmatprep.subr.bf16.mxu1 %v916_v8 }
  0x45   : > { %780 = vmatpush3.bf16.msra.mxu0 %v917_v9  ;;  %847 = vmatpush3.bf16.msra.mxu1 %v917_v9 }
  0x46   : > { %781 = vmatprep.subr.bf16.mxu0 %v918_v10  ;;  %840 = vmatprep.subr.bf16.mxu1 %v918_v10 }
  0x49   : > { %782 = vmatpush3.bf16.msra.mxu0 %v919_v13  ;;  %848 = vmatpush3.bf16.msra.mxu1 %v919_v13 }
  0x4a   : > { %783 = vmatprep.subr.bf16.mxu0 %v920_v14  ;;  %841 = vmatprep.subr.bf16.mxu1 %v920_v14 }
  0x4d   : > { %784 = vmatpush3.bf16.msra.mxu0 %v921_v15  ;;  %849 = vmatpush3.bf16.msra.mxu1 %v921_v15 }
  0x4e   : > { %785 = vmatprep.subr.bf16.mxu0 %v922_v16  ;;  %842 = vmatprep.subr.bf16.mxu1 %v922_v16 }
  0x51   : > { %786 = vmatpush3.bf16.msra.mxu0 %v923_v17  ;;  %850 = vmatpush3.bf16.msra.mxu1 %v923_v17 }
  0x54   : > { %510 = vmatmul.mubr.bf16.vlgmr.msra.gmra.mrb[0].mxu0 %v924_v18  ;;  %542 = vmatmul.mubr.bf16.vlgmr.msra.gmra.mrb[0].mxu1 %v927_v19 }
  0x55   : > { %517 = vmatprep.mubr.bf16.mxu0 %v930_v20  ;;  %549 = vmatprep.mubr.bf16.mxu1 %v932_v21 }
  0x5c   : > { %518 = vmatmul.mubr.bf16.gmra.mrb[4].mxu0 %v934_v22  ;;  %550 = vmatmul.mubr.bf16.gmra.mrb[4].mxu1 %v935_v23 }
  0x5d   : > { %525 = vmatprep.mubr.bf16.mxu0 %v936_v24  ;;  %557 = vmatprep.mubr.bf16.mxu1 %v938_v25 }
  0x64   : > { %526 = vmatmul.mubr.bf16.gmra.mrb[8].mxu0 %v940_v26  ;;  %558 = vmatmul.mubr.bf16.gmra.mrb[8].mxu1 %v941_v27 }
  0x65   : > { %533 = vmatprep.mubr.bf16.mxu0 %v942_v28  ;;  %565 = vmatprep.mubr.bf16.mxu1 %v944_v29 }
  0x6c   : > { %534 = vmatmul.mubr.bf16.gmra.mrb[12].mxu0 %v946_v30  ;;  %566 = vmatmul.mubr.bf16.gmra.mrb[12].mxu1 %v947_v31 }
 0x127   : > { %v787_v32 = vpop.f32.mrb[0].mxu0  ;;  %v811_v33 = vpop.f32.mrb[0].mxu1 }
 0x128   : > { %v788_v35 = vpop.f32.mrb[1].mxu0  ;;  %v812_v36 = vpop.f32.mrb[1].mxu1 }
 0x129   : > { %v789_v37 = vadd.f32 %v788_v35, %v787_v32  ;;  %v813_v38 = vadd.f32 %v812_v36, %v811_v33  ;;  %v790_v39 = vpop.f32.mrb[2].mxu0  ;;  %v814_v40 = vpop.f32.mrb[2].mxu1 }
 0x12a   : > { %v791_v41 = vpop.f32.mrb[3].mxu0  ;;  %v815_v42 = vpop.f32.mrb[3].mxu1 }
 0x12b   : > { %v512_v43 = vadd.f32 %v789_v37, %v1224_v34  ;;  %v544_v44 = vadd.f32 %v813_v38, %v1224_v34  ;;  %v792_v45 = vadd.f32 %v791_v41, %v790_v39  ;;  %v816_v46 = vadd.f32 %v815_v42, %v814_v40 }
 0x12d   : > { %v574_v47 = vmax.f32 %v512_v43, 0.0  ;;  %v582_v48 = vmax.f32 %v544_v44, 0.0  ;;  %v515_v49 = vadd.f32 %v792_v45, %v1224_v34  ;;  %v547_v50 = vadd.f32 %v816_v46, %v1224_v34 }
 0x12f   : > { %591 = vst.msk [vmem:[%s1231_s29] sm:$0xff] %vm590_vm0, %v574_v47  ;;  %599 = vst.msk [vmem:[%s1231_s29 + $0x40] sm:$0xff] %vm590_vm0, %v582_v48  ;;  %v575_v51 = vmax.f32 %v515_v49, 0.0  ;;  %v583_v52 = vmax.f32 %v547_v50, 0.0  ;;  %v793_v53 = vpop.f32.mrb[4].mxu0  ;;  %v817_v54 = vpop.f32.mrb[4].mxu1 }
 0x130   : > { %v794_v55 = vpop.f32.mrb[5].mxu0  ;;  %v818_v56 = vpop.f32.mrb[5].mxu1 }
 0x131   : > { %592 = vst.msk [vmem:[%s1231_s29 + $0x8] sm:$0xff] %vm590_vm0, %v575_v51  ;;  %600 = vst.msk [vmem:[%s1231_s29 + $0x48] sm:$0xff] %vm590_vm0, %v583_v52  ;;  %v795_v57 = vadd.f32 %v794_v55, %v793_v53  ;;  %v819_v58 = vadd.f32 %v818_v56, %v817_v54  ;;  %v796_v59 = vpop.f32.mrb[6].mxu0  ;;  %v820_v60 = vpop.f32.mrb[6].mxu1 }
 0x132   : > { %v797_v61 = vpop.f32.mrb[7].mxu0  ;;  %v821_v62 = vpop.f32.mrb[7].mxu1 }
 0x133   : > { %v520_v63 = vadd.f32 %v795_v57, %v1224_v34  ;;  %v552_v0 = vadd.f32 %v819_v58, %v1224_v34  ;;  %v798_v1 = vadd.f32 %v797_v61, %v796_v59  ;;  %v822_v2 = vadd.f32 %v821_v62, %v820_v60 }
 0x135   : > { %v576_v3 = vmax.f32 %v520_v63, 0.0  ;;  %v584_v4 = vmax.f32 %v552_v0, 0.0  ;;  %v523_v5 = vadd.f32 %v798_v1, %v1224_v34  ;;  %v555_v6 = vadd.f32 %v822_v2, %v1224_v34 }
 0x137   : > { %593 = vst.msk [vmem:[%s1231_s29 + $0x10] sm:$0xff] %vm590_vm0, %v576_v3  ;;  %601 = vst.msk [vmem:[%s1231_s29 + $0x50] sm:$0xff] %vm590_vm0, %v584_v4  ;;  %v577_v7 = vmax.f32 %v523_v5, 0.0  ;;  %v585_v8 = vmax.f32 %v555_v6, 0.0  ;;  %v799_v9 = vpop.f32.mrb[8].mxu0  ;;  %v823_v10 = vpop.f32.mrb[8].mxu1 }
 0x138   : > { %v800_v11 = vpop.f32.mrb[9].mxu0  ;;  %v824_v12 = vpop.f32.mrb[9].mxu1 }
 0x139   : > { %594 = vst.msk [vmem:[%s1231_s29 + $0x18] sm:$0xff] %vm590_vm0, %v577_v7  ;;  %602 = vst.msk [vmem:[%s1231_s29 + $0x58] sm:$0xff] %vm590_vm0, %v585_v8  ;;  %v801_v13 = vadd.f32 %v800_v11, %v799_v9  ;;  %v825_v14 = vadd.f32 %v824_v12, %v823_v10  ;;  %v802_v15 = vpop.f32.mrb[10].mxu0  ;;  %v826_v16 = vpop.f32.mrb[10].mxu1 }
 0x13a   : > { %v803_v17 = vpop.f32.mrb[11].mxu0  ;;  %v827_v18 = vpop.f32.mrb[11].mxu1 }
 0x13b   : > { %v528_v19 = vadd.f32 %v801_v13, %v1224_v34  ;;  %v560_v20 = vadd.f32 %v825_v14, %v1224_v34  ;;  %v804_v21 = vadd.f32 %v803_v17, %v802_v15  ;;  %v828_v22 = vadd.f32 %v827_v18, %v826_v16 }
 0x13d   : > { %v578_v23 = vmax.f32 %v528_v19, 0.0  ;;  %v586_v24 = vmax.f32 %v560_v20, 0.0  ;;  %v531_v25 = vadd.f32 %v804_v21, %v1224_v34  ;;  %v563_v26 = vadd.f32 %v828_v22, %v1224_v34 }
 0x13f   : > { %595 = vst.msk [vmem:[%s1231_s29 + $0x20] sm:$0xff] %vm590_vm0, %v578_v23  ;;  %603 = vst.msk [vmem:[%s1231_s29 + $0x60] sm:$0xff] %vm590_vm0, %v586_v24  ;;  %v579_v27 = vmax.f32 %v531_v25, 0.0  ;;  %v587_v28 = vmax.f32 %v563_v26, 0.0  ;;  %v805_v29 = vpop.f32.mrb[12].mxu0  ;;  %v829_v30 = vpop.f32.mrb[12].mxu1 }
 0x140   : > { %v806_v31 = vpop.f32.mrb[13].mxu0  ;;  %v830_v32 = vpop.f32.mrb[13].mxu1 }
 0x141   : > { %596 = vst.msk [vmem:[%s1231_s29 + $0x28] sm:$0xff] %vm590_vm0, %v579_v27  ;;  %604 = vst.msk [vmem:[%s1231_s29 + $0x68] sm:$0xff] %vm590_vm0, %v587_v28  ;;  %v807_v33 = vadd.f32 %v806_v31, %v805_v29  ;;  %v831_v35 = vadd.f32 %v830_v32, %v829_v30  ;;  %v808_v36 = vpop.f32.mrb[14].mxu0  ;;  %v832_v37 = vpop.f32.mrb[14].mxu1 }
 0x142   : > { %v809_v38 = vpop.f32.mrb[15].mxu0  ;;  %v833_v39 = vpop.f32.mrb[15].mxu1 }
 0x143   : > { %v536_v40 = vadd.f32 %v807_v33, %v1224_v34  ;;  %v568_v41 = vadd.f32 %v831_v35, %v1224_v34  ;;  %v810_v42 = vadd.f32 %v809_v38, %v808_v36  ;;  %v834_v43 = vadd.f32 %v833_v39, %v832_v37 }
 0x145   : > { %v580_v44 = vmax.f32 %v536_v40, 0.0  ;;  %v588_v45 = vmax.f32 %v568_v41, 0.0  ;;  %v539_v46 = vadd.f32 %v810_v42, %v1224_v34  ;;  %v571_v47 = vadd.f32 %v834_v43, %v1224_v34 }
 0x147   : > { %597 = vst.msk [vmem:[%s1231_s29 + $0x30] sm:$0xff] %vm590_vm0, %v580_v44  ;;  %605 = vst.msk [vmem:[%s1231_s29 + $0x70] sm:$0xff] %vm590_vm0, %v588_v45  ;;  %v581_v48 = vmax.f32 %v539_v46, 0.0  ;;  %v589_v49 = vmax.f32 %v571_v47, 0.0 }
 0x149   : > { %598 = vst.msk [vmem:[%s1231_s29 + $0x38] sm:$0xff] %vm590_vm0, %v581_v48  ;;  %606 = vst.msk [vmem:[%s1231_s29 + $0x78] sm:$0xff] %vm590_vm0, %v589_v49 }
 0x14a PF: > { %s16_s17 = sadd.s32 1, %s1028_s17   ;;  %s1304_s12 = smov %s1012_s13 }
 0x14b   : > { %p13_p9 = scmp.ge.s32.totalorder %s16_s17, 6   ;;  %s1305_s13 = smov %s1016_s14 }
 0x14c   : > { %s1306_s14 = smov %s1102_s24  ;;  %s1307_s15 = smov %s1024_s16 }
 0x14d   : > { %s1308_s16 = smov %s1310_s19  ;;  %15 = sbr.rel (!%p13_p9) target bundleno = 4 (0x4), region = 78 }
 0x154   :  { %635 = vsyncpa [#allocation3], 1 }
 0x155   :  { %637 = vsyncpa [#allocation3 + $0x1], 1 }

</bundles_post_ra>
